<compile_context>
chip_gen: v6e
topology: v6e:2x2x1
jax: 0.10.0
libtpu: 0.0.40
codegen_flags: <defaults>
</compile_context>

<pallas_src>
import functools
import math

import jax
import jax.numpy as jnp
from jax.experimental import pallas as pl
from jax.experimental.pallas import tpu as pltpu


def _round_up(n: int, m: int) -> int:
    return ((n + m - 1) // m) * m


def _cdiv(n: int, m: int) -> int:
    return (n + m - 1) // m


# ---------------------------------------------------------------------------
# General path: HBM-resident table, double-buffered per-row DMA gather.
# ---------------------------------------------------------------------------
def _embedding_gather_kernel(ids_ref, table_ref, o_ref, rows_ref, sems, *, tm, scale):
    """Gather `tm` embedding rows per grid step via per-row async DMAs.

    ids_ref   : SMEM scalar-prefetch ref, (n_blocks*tm,) int32 token ids
    table_ref : HBM ref (pl.ANY), (V, D) embedding table
    o_ref     : VMEM output block, (tm, D)
    rows_ref  : VMEM scratch, (2*tm, D)  -- two slots of tm rows (double buffer)
    sems      : DMA semaphores, (2*tm,)  -- one per in-flight row DMA
    """
    o = pl.program_id(0)
    inn = pl.program_id(1)
    n_inner = pl.num_programs(1)

    def issue(block_idx, slot):
        base_id = block_idx * tm
        base_row = slot * tm
        for t in range(tm):  # static unrolled; tm is modest (<= 128)
            tok = ids_ref[base_id + t]
            pltpu.make_async_copy(
                table_ref.at[pl.ds(tok, 1), :],          # one (1, D) row from HBM
                rows_ref.at[pl.ds(base_row + t, 1), :],  # into row t of slot `slot`
                sems.at[base_row + t],
            ).start()

    # Prime the pipeline at the start of this core's contiguous inner sweep.
    @pl.when(inn == 0)
    def _():
        issue(o * n_inner, 0)

    # Cross-step prefetch: issue block (inn+1)'s DMAs into the other slot BEFORE
    # waiting on the current slot. All ids are SMEM-resident, so every scalar id
    # read stays ahead of the first .wait().
    @pl.when(inn + 1 < n_inner)
    def _():
        issue(o * n_inner + inn + 1, (inn + 1) & 1)

    # Wait on the current slot's row DMAs, then scale + lane-dense store.
    slot = inn & 1
    base_row = slot * tm
    for t in range(tm):
        pltpu.make_async_copy(
            table_ref.at[pl.ds(0, 1), :],                # placeholder src; wait uses sem + dst size
            rows_ref.at[pl.ds(base_row + t, 1), :],
            sems.at[base_row + t],
        ).wait()

    start = pl.multiple_of(base_row, 8)
    rows = rows_ref[pl.ds(start, tm), :]
    o_ref[...] = (rows.astype(jnp.float32) * scale).astype(o_ref.dtype)


# ---------------------------------------------------------------------------
# Fast path: whole table resident in VMEM, gather via dynamic slices.
# ---------------------------------------------------------------------------
def _embedding_vmem_kernel(ids_ref, table_ref, o_ref, *, tm, scale):
    o = pl.program_id(0)
    inn = pl.program_id(1)
    base = (o * pl.num_programs(1) + inn) * tm
    # Note: for D < 128 each row store is a masked vst; acceptable for the small
    # tables this path targets (lane-dense repacking not worth the complexity here).
    for t in range(tm):
        tok = ids_ref[base + t]
        row = table_ref[pl.ds(tok, 1), :]
        o_ref[pl.ds(t, 1), :] = (row.astype(jnp.float32) * scale).astype(o_ref.dtype)


# ---------------------------------------------------------------------------
# Wrapper
# ---------------------------------------------------------------------------
def _pick_tm(M: int, D: int, itemsize: int) -> int:
    # Start at 128 rows/block; shrink until the double-buffered scratch plus the
    # pipelined output (~4 * tm * D * itemsize) stays under ~12 MiB (safe for the
    # v5e 16 MiB / v6e 32 MiB / v7x 32 MiB-per-core scoped VMEM budgets).
    tm = 128
    while tm > 8 and 4 * tm * D * itemsize > 12 * (1 << 20):
        tm //= 2
    # Keep >= 4 blocks of work so a v7x outer split gives each TensorCore >= 2 blocks.
    tm = min(tm, _round_up(_cdiv(M, 4), 8))
    return max(tm, 8)


def input_embeddings(token_ids, table, d_model=None, *, tm=None, force_hbm_gather=False):
    """token_ids: (...,) integer array, table: (vocab_size, d_model).

    Returns table[token_ids] * sqrt(d_model) with shape (*token_ids.shape, d_model).
    Token ids are assumed to be in range [0, vocab_size) (same contract as nn.Embedding).
    """
    V, D = table.shape
    d_model = D if d_model is None else d_model
    scale = math.sqrt(float(d_model))

    orig_shape = token_ids.shape
    ids = token_ids.reshape(-1).astype(jnp.int32)
    M = int(ids.shape[0])

    itemsize = int(jnp.dtype(table.dtype).itemsize)
    if tm is None:
        tm = _pick_tm(M, D, itemsize)
    tm = max(8, _round_up(int(tm), 8))

    n_blocks = _cdiv(M, tm)
    # Outer "parallel" axis feeds v7x's two TensorCores; each outer chunk runs its
    # own primed double-buffer pipeline over the inner "arbitrary" axis.
    n_outer = 2 if (n_blocks >= 2 and n_blocks % 2 == 0) else 1
    n_inner = n_blocks // n_outer

    # Pad only the SMEM id vector so every block's scalar reads are in bounds
    # (4 bytes/token). The output is NOT padded -> no wrapper-side out[:M] copy.
    ids_len = n_blocks * tm
    if ids_len != M:
        ids = jnp.pad(ids, (0, ids_len - M))  # token 0 = valid row; tail stores masked

    table_bytes = V * D * itemsize
    use_vmem_table = (not force_hbm_gather) and table_bytes <= 8 * (1 << 20)

    grid = (n_outer, n_inner)
    out_spec = pl.BlockSpec((tm, D), lambda o, i, ids_ref: (o * n_inner + i, 0))

    if use_vmem_table:
        kernel = functools.partial(_embedding_vmem_kernel, tm=tm, scale=scale)
        in_specs = [pl.BlockSpec((V, D), lambda o, i, ids_ref: (0, 0))]  # table stays VMEM-resident
        scratch_shapes = []
        vmem_needed = table_bytes + 2 * tm * D * itemsize
        bytes_accessed = table_bytes + M * D * itemsize + M * 4
    else:
        kernel = functools.partial(_embedding_gather_kernel, tm=tm, scale=scale)
        in_specs = [pl.BlockSpec(memory_space=pl.ANY)]  # table in HBM; gathered via row DMAs
        scratch_shapes = [
            pltpu.VMEM((2 * tm, D), table.dtype),        # double-buffered gathered rows
            pltpu.SemaphoreType.DMA((2 * tm,)),          # one sem per in-flight row DMA
        ]
        vmem_needed = 4 * tm * D * itemsize
        bytes_accessed = 2 * M * D * itemsize + M * 4

    vmem_limit = int(min(max(2 * vmem_needed, 32 * (1 << 20)), 64 * (1 << 20)))

    out = pl.pallas_call(
        kernel,
        out_shape=jax.ShapeDtypeStruct((M, D), table.dtype),
        grid_spec=pltpu.PrefetchScalarGridSpec(
            num_scalar_prefetch=1,                       # token ids -> SMEM
            grid=grid,
            in_specs=in_specs,
            out_specs=out_spec,
            scratch_shapes=scratch_shapes,
        ),
        compiler_params=pltpu.CompilerParams(
            dimension_semantics=("parallel", "arbitrary"),
            vmem_limit_bytes=vmem_limit,
        ),
        cost_estimate=pl.CostEstimate(
            flops=M * D,                                 # the sqrt(d_model) scale multiply
            transcendentals=0,
            bytes_accessed=int(bytes_accessed),
        ),
    )(ids, table)

    return out.reshape(orig_shape + (D,))


def init_embedding_params(key, vocab_size, d_model, dtype=jnp.float32):
    # nn.Embedding default init: N(0, 1)
    return jax.random.normal(key, (vocab_size, d_model), dtype)


if __name__ == "__main__":
    key = jax.random.PRNGKey(0)
    k_ids, k_emb = jax.random.split(key)

    batch, seq, d_model, vocab_size = 2, 8, 32, 128
    token_ids = jax.random.randint(k_ids, (batch, seq), 0, vocab_size, dtype=jnp.int32)
    table = init_embedding_params(k_emb, vocab_size, d_model)

    y_ref = table[token_ids] * math.sqrt(d_model)

    # Small-table fast path (table resident in VMEM).
    y_fast = jax.block_until_ready(input_embeddings(token_ids, table, d_model))
    assert y_fast.shape == (batch, seq, d_model), y_fast.shape
    assert jnp.allclose(y_fast, y_ref, atol=1e-5, rtol=1e-5), float(
        jnp.max(jnp.abs(y_fast - y_ref)))

    # General path (HBM table + double-buffered per-row DMA gather), forced for coverage.
    y_hbm = jax.block_until_ready(
        input_embeddings(token_ids, table, d_model, force_hbm_gather=True))
    assert y_hbm.shape == (batch, seq, d_model), y_hbm.shape
    assert jnp.allclose(y_hbm, y_ref, atol=1e-5, rtol=1e-5), float(
        jnp.max(jnp.abs(y_hbm - y_ref)))

    print("KERNEL_OK")
</pallas_src>

<mosaic_0001>
module attributes {stable_mosaic.version = 11 : i64} {
  func.func @_embedding_vmem_kernel(%arg0: i32, %arg1: i32, %arg2: memref<16xi32, #tpu.memory_space<smem>>, %arg3: memref<128x32xf32, #tpu.memory_space<vmem>>, %arg4: memref<8x32xf32, #tpu.memory_space<vmem>>) attributes {dimension_semantics = [#tpu.dimension_semantics<parallel>, #tpu.dimension_semantics<arbitrary>], iteration_bounds = array<i64: 2, 1>, scalar_prefetch = 1 : i64, scratch_operands = 0 : i64, tpu.core_type = #tpu.core_type<tc>, window_params = [{pipeline_mode = #tpu.pipeline_mode<synchronous>, transform_indices = @transform_0, window_bounds = array<i64: 128, 32>}, {transform_indices = @transform_1, window_bounds = array<i64: 8, 32>}]} {
    %c1_i32 = arith.constant 1 : i32
    %0 = arith.muli %arg0, %c1_i32 : i32
    %1 = arith.addi %0, %arg1 : i32
    %c8_i32 = arith.constant 8 : i32
    %2 = arith.muli %1, %c8_i32 : i32
    %c0_i32 = arith.constant 0 : i32
    %3 = arith.addi %2, %c0_i32 : i32
    %4 = arith.index_cast %3 : i32 to index
    %5 = memref.load %arg2[%4] : memref<16xi32, #tpu.memory_space<smem>>
    %6 = arith.index_cast %5 : i32 to index
    %c0 = arith.constant 0 : index
    %7 = vector.load %arg3[%6, %c0] : memref<128x32xf32, #tpu.memory_space<vmem>>, vector<1x32xf32>
    %cst = arith.constant 5.65685415 : f32
    %8 = vector.broadcast %cst : f32 to vector<1x32xf32>
    %9 = arith.mulf %7, %8 : vector<1x32xf32>
    %c0_0 = arith.constant 0 : index
    %c0_1 = arith.constant 0 : index
    %10 = vector.load %arg4[%c0_0, %c0_1] : memref<8x32xf32, #tpu.memory_space<vmem>>, vector<1x32xf32>
    tpu.vector_store %arg4[%c0_0, %c0_1], %9 {strides = array<i32>} : memref<8x32xf32, #tpu.memory_space<vmem>>, vector<1x32xf32>,
    %c1_i32_2 = arith.constant 1 : i32
    %11 = arith.addi %2, %c1_i32_2 : i32
    %12 = arith.index_cast %11 : i32 to index
    %13 = memref.load %arg2[%12] : memref<16xi32, #tpu.memory_space<smem>>
    %14 = arith.index_cast %13 : i32 to index
    %c0_3 = arith.constant 0 : index
    %15 = vector.load %arg3[%14, %c0_3] : memref<128x32xf32, #tpu.memory_space<vmem>>, vector<1x32xf32>
    %cst_4 = arith.constant 5.65685415 : f32
    %16 = vector.broadcast %cst_4 : f32 to vector<1x32xf32>
    %17 = arith.mulf %15, %16 : vector<1x32xf32>
    %c1 = arith.constant 1 : index
    %c0_5 = arith.constant 0 : index
    %18 = vector.load %arg4[%c1, %c0_5] : memref<8x32xf32, #tpu.memory_space<vmem>>, vector<1x32xf32>
    tpu.vector_store %arg4[%c1, %c0_5], %17 {strides = array<i32>} : memref<8x32xf32, #tpu.memory_space<vmem>>, vector<1x32xf32>,
    %c2_i32 = arith.constant 2 : i32
    %19 = arith.addi %2, %c2_i32 : i32
    %20 = arith.index_cast %19 : i32 to index
    %21 = memref.load %arg2[%20] : memref<16xi32, #tpu.memory_space<smem>>
    %22 = arith.index_cast %21 : i32 to index
    %c0_6 = arith.constant 0 : index
    %23 = vector.load %arg3[%22, %c0_6] : memref<128x32xf32, #tpu.memory_space<vmem>>, vector<1x32xf32>
    %cst_7 = arith.constant 5.65685415 : f32
    %24 = vector.broadcast %cst_7 : f32 to vector<1x32xf32>
    %25 = arith.mulf %23, %24 : vector<1x32xf32>
    %c2 = arith.constant 2 : index
    %c0_8 = arith.constant 0 : index
    %26 = vector.load %arg4[%c2, %c0_8] : memref<8x32xf32, #tpu.memory_space<vmem>>, vector<1x32xf32>
    tpu.vector_store %arg4[%c2, %c0_8], %25 {strides = array<i32>} : memref<8x32xf32, #tpu.memory_space<vmem>>, vector<1x32xf32>,
    %c3_i32 = arith.constant 3 : i32
    %27 = arith.addi %2, %c3_i32 : i32
    %28 = arith.index_cast %27 : i32 to index
    %29 = memref.load %arg2[%28] : memref<16xi32, #tpu.memory_space<smem>>
    %30 = arith.index_cast %29 : i32 to index
    %c0_9 = arith.constant 0 : index
    %31 = vector.load %arg3[%30, %c0_9] : memref<128x32xf32, #tpu.memory_space<vmem>>, vector<1x32xf32>
    %cst_10 = arith.constant 5.65685415 : f32
    %32 = vector.broadcast %cst_10 : f32 to vector<1x32xf32>
    %33 = arith.mulf %31, %32 : vector<1x32xf32>
    %c3 = arith.constant 3 : index
    %c0_11 = arith.constant 0 : index
    %34 = vector.load %arg4[%c3, %c0_11] : memref<8x32xf32, #tpu.memory_space<vmem>>, vector<1x32xf32>
    tpu.vector_store %arg4[%c3, %c0_11], %33 {strides = array<i32>} : memref<8x32xf32, #tpu.memory_space<vmem>>, vector<1x32xf32>,
    %c4_i32 = arith.constant 4 : i32
    %35 = arith.addi %2, %c4_i32 : i32
    %36 = arith.index_cast %35 : i32 to index
    %37 = memref.load %arg2[%36] : memref<16xi32, #tpu.memory_space<smem>>
    %38 = arith.index_cast %37 : i32 to index
    %c0_12 = arith.constant 0 : index
    %39 = vector.load %arg3[%38, %c0_12] : memref<128x32xf32, #tpu.memory_space<vmem>>, vector<1x32xf32>
    %cst_13 = arith.constant 5.65685415 : f32
    %40 = vector.broadcast %cst_13 : f32 to vector<1x32xf32>
    %41 = arith.mulf %39, %40 : vector<1x32xf32>
    %c4 = arith.constant 4 : index
    %c0_14 = arith.constant 0 : index
    %42 = vector.load %arg4[%c4, %c0_14] : memref<8x32xf32, #tpu.memory_space<vmem>>, vector<1x32xf32>
    tpu.vector_store %arg4[%c4, %c0_14], %41 {strides = array<i32>} : memref<8x32xf32, #tpu.memory_space<vmem>>, vector<1x32xf32>,
    %c5_i32 = arith.constant 5 : i32
    %43 = arith.addi %2, %c5_i32 : i32
    %44 = arith.index_cast %43 : i32 to index
    %45 = memref.load %arg2[%44] : memref<16xi32, #tpu.memory_space<smem>>
    %46 = arith.index_cast %45 : i32 to index
    %c0_15 = arith.constant 0 : index
    %47 = vector.load %arg3[%46, %c0_15] : memref<128x32xf32, #tpu.memory_space<vmem>>, vector<1x32xf32>
    %cst_16 = arith.constant 5.65685415 : f32
    %48 = vector.broadcast %cst_16 : f32 to vector<1x32xf32>
    %49 = arith.mulf %47, %48 : vector<1x32xf32>
    %c5 = arith.constant 5 : index
    %c0_17 = arith.constant 0 : index
    %50 = vector.load %arg4[%c5, %c0_17] : memref<8x32xf32, #tpu.memory_space<vmem>>, vector<1x32xf32>
    tpu.vector_store %arg4[%c5, %c0_17], %49 {strides = array<i32>} : memref<8x32xf32, #tpu.memory_space<vmem>>, vector<1x32xf32>,
    %c6_i32 = arith.constant 6 : i32
    %51 = arith.addi %2, %c6_i32 : i32
    %52 = arith.index_cast %51 : i32 to index
    %53 = memref.load %arg2[%52] : memref<16xi32, #tpu.memory_space<smem>>
    %54 = arith.index_cast %53 : i32 to index
    %c0_18 = arith.constant 0 : index
    %55 = vector.load %arg3[%54, %c0_18] : memref<128x32xf32, #tpu.memory_space<vmem>>, vector<1x32xf32>
    %cst_19 = arith.constant 5.65685415 : f32
    %56 = vector.broadcast %cst_19 : f32 to vector<1x32xf32>
    %57 = arith.mulf %55, %56 : vector<1x32xf32>
    %c6 = arith.constant 6 : index
    %c0_20 = arith.constant 0 : index
    %58 = vector.load %arg4[%c6, %c0_20] : memref<8x32xf32, #tpu.memory_space<vmem>>, vector<1x32xf32>
    tpu.vector_store %arg4[%c6, %c0_20], %57 {strides = array<i32>} : memref<8x32xf32, #tpu.memory_space<vmem>>, vector<1x32xf32>,
    %c7_i32 = arith.constant 7 : i32
    %59 = arith.addi %2, %c7_i32 : i32
    %60 = arith.index_cast %59 : i32 to index
    %61 = memref.load %arg2[%60] : memref<16xi32, #tpu.memory_space<smem>>
    %62 = arith.index_cast %61 : i32 to index
    %c0_21 = arith.constant 0 : index
    %63 = vector.load %arg3[%62, %c0_21] : memref<128x32xf32, #tpu.memory_space<vmem>>, vector<1x32xf32>
    %cst_22 = arith.constant 5.65685415 : f32
    %64 = vector.broadcast %cst_22 : f32 to vector<1x32xf32>
    %65 = arith.mulf %63, %64 : vector<1x32xf32>
    %c7 = arith.constant 7 : index
    %c0_23 = arith.constant 0 : index
    %66 = vector.load %arg4[%c7, %c0_23] : memref<8x32xf32, #tpu.memory_space<vmem>>, vector<1x32xf32>
    tpu.vector_store %arg4[%c7, %c0_23], %65 {strides = array<i32>} : memref<8x32xf32, #tpu.memory_space<vmem>>, vector<1x32xf32>,
    return
  }
  func.func @transform_0(%arg0: i32, %arg1: i32, %arg2: memref<16xi32, #tpu.memory_space<smem>>) -> (i32, i32) {
    %c0_i32 = arith.constant 0 : i32
    %c0_i32_0 = arith.constant 0 : i32
    %c0_i32_1 = arith.constant 0 : i32
    return %c0_i32, %c0_i32_0 : i32, i32
  }
  func.func @transform_1(%arg0: i32, %arg1: i32, %arg2: memref<16xi32, #tpu.memory_space<smem>>) -> (i32, i32) {
    %c1_i32 = arith.constant 1 : i32
    %0 = arith.muli %arg0, %c1_i32 : i32
    %1 = arith.addi %0, %arg1 : i32
    %c0_i32 = arith.constant 0 : i32
    %c0_i32_0 = arith.constant 0 : i32
    return %1, %c0_i32 : i32, i32
  }
}

</mosaic_0001>

<bundles_post_ra>
// kernel: tpu_custom_call.1
= control target key start
LH: loop header
LB: loop body
LE: loop exit
PB: predicated region body
PF: predicated region fallthrough
CT: control target
= control target key end

     0   :  { %s572_s0 = inlined_call_operand.vmem [shape: s32[16], index: 0, kind: input, shape index: {}]   ;;  %s573_s1 = inlined_call_operand.vmem [shape: f32[128,32], index: 1, kind: input, shape index: {}]   ;;  %s574_s2 = inlined_call_operand.hbm [shape: f32[16,32], index: 2, kind: output, shape index: {}]  }
   0x1   :  { %s7_s11 = sshll.u32 %s572_s0, 4  ;;  %s8_s11 = int_to_ptr.vmem [resolvable:$true] %s7_s11 }
   0x2   :  { %s312_s12 = scalar_lea.vmem %s8_s11, 16  ;;  %p317_p1 = scmp.lt.s32.totalorder %s8_s11, %s8_s11 }
   0x3   :  { %p313_p0 = scmp.ne.s32.totalorder %s8_s11, %s312_s12  ;;  %p318_p2 = scmp.lt.s32.totalorder %s312_s12, %s312_s12 }
   0x5   :  { %p319_p3 = por %p318_p2, %p317_p1 }
   0x7   :  { %p320_p4 = pnand %p319_p3, %p313_p0 }
   0x9   :  { %323 = shalt.err (!%p320_p4)  }
   0xa   :  { %s404_s13 = smov [#allocation3]  }
   0xb   :  { %10 = dma.vmem_to_smem %s8_s11, 16, %s404_s13, [#allocation2] }
   0xc   :  { %374 = dma.done.wait [#allocation2], 16 }
   0xd   :  { %375 = vsyncadd [#allocation2], 4294967280 }
   0xe   :  { %12 = sfence }
   0xf   :  { %13 = vsyncpa [#allocation5], 0 }
  0x10   :  { %15 = vsyncpa [#allocation5 + $0x1], 0  ;;  %s424_s14 = smov 0   ;;  %s426_s15 = smov 0  }
  0x11   :  { %s428_s0 = smov 0   ;;  %s430_s16 = smov 0  }
  0x12   :  { %s432_s17 = smov 0   ;;  %s434_s18 = smov 0  }
  0x13 LB: > { %578 = sst [smem:[#allocation8_spill]] %s398_s17  ;;  %s246_s19 = sadd.s32 4294967295, %s402_s18   ;;  %s402_s18 = sphi %s434_s18, %s21_s18   ;;  %s398_s17 = sphi %s432_s17, %s584_s17   ;;  %s394_s16 = sphi %s430_s16, %s583_s16   ;;  %s390_s0 = sphi %s428_s0, %s587_s0   ;;  %s386_s15 = sphi %s426_s15, %s586_s15   ;;  %s382_s14 = sphi %s424_s14, %s585_s14  }
  0x14   : > { %s247_s20 = sadd.s32 4294967294, %s402_s18   ;;  %s33_s21 = sadd.s32 1, %s398_s17 }
  0x15   : > { %s63_s22 = sadd.s32 1, %s390_s0  ;;  %p35_p5 = scmp.ge.s32.totalorder %s33_s21, 2 }
  0x16   : > { %p73_p6 = scmp.ne.s32.totalorder %s390_s0, %s386_s15  ;;  %p74_p7 = scmp.eq.s32.totalorder %s246_s19, 1 }
  0x17   : > { %p79_p8 = scmp.ne.s32.totalorder %s386_s15, %s382_s14  ;;  %s589_s21 = smov (%p35_p5, %s33_s21), 0 }
  0x18   : > { %579 = sst [smem:[#allocation9_spill]] %s589_s21  ;;  %p464_p9 = por %p74_p7, %p73_p6 }
  0x19   : > { %p80_p10 = scmp.eq.s32.totalorder %s247_s20, 1  ;;  %s60_s24 = ssub.s32 %s398_s17, %s589_s21 }
  0x1a   : > { %p249_p11 = scmp.ge.s32.totalorder %s402_s18, 1  ;;  %p61_p12 = scmp.eq.s32.totalorder %s60_s24, 0 }
  0x1b   : > { %p471_p13 = por %p80_p10, %p79_p8  ;;  %p101_p0 = scmp.lt.s32.totalorder %s402_s18, 3 }
  0x1c   : > { %s477_s26 = scalar_select %p61_p12, %s390_s0, %s63_s22  }
  0x1d   : > { %p102_p1 = pnand %p249_p11, %p101_p0 }
  0x1e   : > { %s575_s27 = sand.u32 (!%p102_p1), 1, %s386_s15   ;;  %s251_s28 = sshll.u32 (!%p102_p1), %s394_s16, 3 }
  0x1f   : > { %105 = sbr.rel (%p102_p1) target bundleno = 71 (0x47), region = 24  ;;  %s250_s29 = sshll.u32 (!%p102_p1), %s575_s27, 3 }
  0x20   : > { %s119_s30 = sld [smem:[#allocation3 + %s251_s28]] (!%p102_p1)  ;;  %s125_s3 = sadd.s32 (!%p102_p1), 1, %s251_s28 }
  0x21   : > { %s131_s4 = sadd.s32 (!%p102_p1), 2, %s251_s28  ;;  %s126_s5 = sld [smem:[#allocation3 + %s125_s3]] (!%p102_p1) }
  0x22   : > { %s137_s6 = sadd.s32 (!%p102_p1), 3, %s251_s28  ;;  %s132_s7 = sld [smem:[#allocation3 + %s131_s4]] (!%p102_p1) }
  0x23   : > { %s143_s8 = sadd.s32 (!%p102_p1), 4, %s251_s28  ;;  %s138_s9 = sld [smem:[#allocation3 + %s137_s6]] (!%p102_p1) }
  0x24   : > { %s149_s10 = sadd.s32 5, %s251_s28  ;;  %s144_s19 = sld [smem:[#allocation3 + %s143_s8]]  ;;  %vm123_vm0 = vcmask 253952  }
  0x25   : > { %s150_s20 = sld [smem:[#allocation3 + %s149_s10]]  ;;  %s155_s22 = sadd.s32 6, %s251_s28 }
  0x26   : > { %s120_s13 = scalar_lea.vmem %s573_s1, %s119_s30  ;;  %s156_s24 = sld [smem:[#allocation3 + %s155_s22]] }
  0x27   : > { %v121_v0 = vld [vmem:[%s120_s13] sm:$0x1]  ;;  %s161_s27 = sadd.s32 7, %s251_s28  ;;  %s127_s3 = scalar_lea.vmem %s573_s1, %s126_s5 }
  0x28   : > { %v122_v1 = vmul.f32 5.656854, %v121_v0  ;;  %s162_s4 = sld [smem:[#allocation3 + %s161_s27]]  ;;  %s489_s6 = scalar_lea.vmem [#allocation4], %s250_s29  ;;  %v128_v2 = vld [vmem:[%s127_s3] sm:$0x1] }
  0x29   : > { %s133_s10 = scalar_lea.vmem %s573_s1, %s132_s7  ;;  %v129_v3 = vmul.f32 5.656854, %v128_v2  ;;  %s139_s27 = scalar_lea.vmem %s573_s1, %s138_s9 }
  0x2a   : > { %124 = vst.msk [vmem:[%s489_s6] sm:$0x1] %vm123_vm0, %v122_v1  ;;  %v134_v4 = vld [vmem:[%s133_s10] sm:$0x1]  ;;  %s145_s5 = scalar_lea.vmem %s573_s1, %s144_s19  ;;  %s253_s13 = sshll.u32 %s394_s16, 7 }
  0x2b   : > { %v135_v5 = vmul.f32 5.656854, %v134_v4  ;;  %v140_v6 = vld [vmem:[%s139_s27] sm:$0x1]  ;;  %130 = vst.msk [vmem:[%s489_s6 + $0x1] sm:$0x1] %vm123_vm0, %v129_v3  ;;  %s151_s12 = scalar_lea.vmem %s573_s1, %s150_s20 }
  0x2c   : > { %v141_v7 = vmul.f32 5.656854, %v140_v6  ;;  %v146_v8 = vld [vmem:[%s145_s5] sm:$0x1]  ;;  %s157_s19 = scalar_lea.vmem %s573_s1, %s156_s24  ;;  %s182_s3 = sshll.u32 %s489_s6, 4  ;;  %s183_s3 = int_to_ptr.vmem [resolvable:$true] %s182_s3 }
  0x2d   : > { %136 = vst.msk [vmem:[%s489_s6 + $0x2] sm:$0x1] %vm123_vm0, %v135_v5  ;;  %v147_v9 = vmul.f32 5.656854, %v146_v8  ;;  %v152_v10 = vld [vmem:[%s151_s12] sm:$0x1]  ;;  %s526_s24 = scalar_lea.hbm %s574_s2, %s253_s13 }
  0x2e   : > { %142 = vst.msk [vmem:[%s489_s6 + $0x3] sm:$0x1] %vm123_vm0, %v141_v7  ;;  %v153_v11 = vmul.f32 5.656854, %v152_v10  ;;  %v158_v12 = vld [vmem:[%s157_s19] sm:$0x1]  ;;  %s163_s16 = scalar_lea.vmem %s573_s1, %s162_s4 }
  0x2f   : > { %148 = vst.msk [vmem:[%s489_s6 + $0x4] sm:$0x1] %vm123_vm0, %v147_v9  ;;  %v159_v13 = vmul.f32 5.656854, %v158_v12  ;;  %v164_v14 = vld [vmem:[%s163_s16] sm:$0x1] }
  0x30   : > { %154 = vst.msk [vmem:[%s489_s6 + $0x5] sm:$0x1] %vm123_vm0, %v153_v11  ;;  %v165_v15 = vmul.f32 5.656854, %v164_v14  ;;  %s582_s17 = sand.u32 1, %s386_s15   ;;  %s324_s4 = scalar_lea.vmem %s183_s3, 128 }
  0x31   : > { %160 = vst.msk [vmem:[%s489_s6 + $0x6] sm:$0x1] %vm123_vm0, %v159_v13  ;;  %s168_s21 = scalar_lea.sflag [#allocation5], %s582_s17  ;;  %p325_p2 = scmp.ne.s32.totalorder %s183_s3, %s324_s4 }
  0x32   : > { %166 = vst.msk [vmem:[%s489_s6 + $0x7] sm:$0x1] %vm123_vm0, %v165_v15  ;;  %s405_s27 = smov [#allocation4]  }
  0x33   : > { %p326_p3 = pnand %p325_p2, %p464_p9  ;;  %s328_s28 = sshll.u32 %s405_s27, 4  ;;  %s329_s28 = int_to_ptr.vmem [resolvable:$false] %s328_s28 }
  0x34   : > { %s330_s29 = scalar_lea.vmem %s329_s28, 256  ;;  %p331_p5 = scmp.lt.s32.totalorder %s183_s3, %s329_s28 }
  0x35   : > { %p327_p4 = pneg %p326_p3  ;;  %p332_p6 = scmp.lt.s32.totalorder %s330_s29, %s324_s4 }
  0x37   : > { %p333_p7 = por %p332_p6, %p331_p5 }
  0x39   : > { %p334_p8 = pnand %p333_p7, %p327_p4 }
  0x3b   : > { %337 = shalt.err (!%p334_p8)
}
  0x3c   : > { %s338_s6 = scalar_lea.hbm %s526_s24, 128  ;;  %s342_s11 = scalar_lea.hbm %s574_s2, 256 }
  0x3d   : > { %p339_p10 = scmp.ne.s32.totalorder %s526_s24, %s338_s6  ;;  %p343_p0 = scmp.lt.s32.totalorder %s526_s24, %s574_s2 }
  0x3e   : > { %p344_p1 = scmp.lt.s32.totalorder %s342_s11, %s338_s6 }
  0x3f   : > { %p340_p11 = pnand %p339_p10, %p464_p9 }
  0x40   : > { %p345_p2 = por %p344_p1, %p343_p0 }
  0x41   : > { %p341_p12 = pneg %p340_p11 }
  0x43   : > { %p346_p3 = pnand %p345_p2, %p341_p12 }
  0x45   : > { %349 = shalt.err (!%p346_p3)
}
  0x46   : > { %256 = dma.vmem_to_hbm [thread:$0]  (%p464_p9), %s183_s3, 128, %s526_s24, %s168_s21  }
  0x47 PF: > { %p262_p4 = scmp.ge.s32.totalorder %s402_s18, 2  ;;  %s194_s9 = sand.u32 1, %s382_s14  }
  0x48   : > { %s195_s22 = scalar_lea.sflag [#allocation5], %s194_s9 }
  0x49   : > { %p259_p5 = pnand %p262_p4, %p471_p13 }
  0x4b   : > { %p260_p6 = pneg %p259_p5 }
  0x4d   : > { %377 = dma.done.wait (%p260_p6), %s195_s22, 128  }
  0x4e   : > { %379 = vsyncadd (%p260_p6), %s195_s22, 4294967168  ;;  %s21_s18 = sadd.s32 1, %s402_s18   ;;  %s583_s16 = sld [smem:[#allocation8_spill]] }
  0x4f   : > { %p18_p7 = scmp.ge.s32.totalorder %s21_s18, 4   ;;  %s584_s17 = sld [smem:[#allocation9_spill]] }
  0x50   : > { %s585_s14 = smov %s386_s15  ;;  %s586_s15 = smov %s390_s0 }
  0x51   : > { %s587_s0 = smov %s477_s26  ;;  %20 = sbr.rel (!%p18_p7) target bundleno = 19 (0x13), region = 64 }
  0x56   :  { %200 = vsyncpa [#allocation5], 1 }
  0x57   :  { %202 = vsyncpa [#allocation5 + $0x1], 1 }

</bundles_post_ra>
